<compile_context>
chip_gen: v7x
topology: tpu7x:2x2x1
jax: 0.10.0
libtpu: 0.0.40
codegen_flags: <defaults>
</compile_context>

<pallas_src>
from functools import partial

import jax
import jax.numpy as jnp
from jax.experimental import pallas as pl
from jax.experimental.pallas import tpu as pltpu


INPUT_SIZE = 4     # iris features
HIDDEN_SIZE = 16
OUTPUT_SIZE = 3

_TB_CAP = 65536    # lane-tile cap: ~170*tb bytes per step => ~11 MiB, < 32 MiB VMEM


def _mlp_kernel(x_ref, w1_ref, b1_ref, w2_ref, b2_ref, o_ref):
    # Shapes (feature-major, batch on the lane axis):
    #   x_ref : (IN, TB)      w1_ref: (H, IN)   b1_ref: (H, 1)
    #   w2_ref: (OUT, H)      b2_ref: (OUT, 1)  o_ref : (OUT, TB)
    x = x_ref[...]            # (IN, TB)
    w1 = w1_ref[...]          # (H, IN)   -- PyTorch (out, in) layout, no transpose
    w2 = w2_ref[...]          # (OUT, H)

    # Layer 1: h = W1 @ x + b1 as IN=4 lane-dense VPU FMAs (skip the MXU).
    h = b1_ref[...] + w1[:, 0:1] * x[0:1, :]               # (H, TB)
    for k in range(1, INPUT_SIZE):
        h = h + w1[:, k:k+1] * x[k:k+1, :]

    # Sigmoid — exact (memory-bound kernel: exact EUP divide is free).
    h = 1.0 / (1.0 + jnp.exp(-h))

    # Layer 2: logits = W2 @ h + b2 as H=16 lane-dense VPU FMAs.
    logits = b2_ref[...] + w2[:, 0:1] * h[0:1, :]           # (OUT, TB)
    for k in range(1, HIDDEN_SIZE):
        logits = logits + w2[:, k:k+1] * h[k:k+1, :]

    # Numerically-stable softmax over the class axis (axis 0 in this layout).
    m = jnp.max(logits, axis=0, keepdims=True)              # (1, TB)
    e = jnp.exp(logits - m)
    denom = jnp.sum(e, axis=0, keepdims=True)               # (1, TB)
    o_ref[...] = (e / denom).astype(o_ref.dtype)            # exact normalization


def prepare_params(w1, b1, w2, b2):
    """One-time packing of PyTorch-layout params (no per-call transposes)."""
    return (
        jnp.asarray(w1, jnp.float32),                        # (H, IN)
        jnp.asarray(b1, jnp.float32).reshape(HIDDEN_SIZE, 1),
        jnp.asarray(w2, jnp.float32),                        # (OUT, H)
        jnp.asarray(b2, jnp.float32).reshape(OUTPUT_SIZE, 1),
    )


def _pick_tb(B):
    """Batch-tile (lane) width.

    Small B: one block equal to the full array extent (always spec-legal).
    Large B: ceil(B/2) rounded up to 128 so the 'parallel' grid axis has at
    least 2 steps (v7x megacore), capped at 64K lanes to stay well inside the
    32 MiB VMEM budget while moving several MB per grid step.
    """
    if B <= 256:
        return B
    half = ((-(-B // 2)) + 127) // 128 * 128
    return min(_TB_CAP, half)


@partial(jax.jit, static_argnames=("tb",))
def mlp_forward(x, params, *, tb=None):
    """x: (B, IN) float32; params from prepare_params(). Returns (B, OUT) probs."""
    w1, b1c, w2, b2c = params
    B = x.shape[0]
    if tb is None:
        tb = _pick_tb(B)

    # Feature-major layout: batch on the 128-lane axis -> lane-dense everywhere.
    # No explicit pad: Pallas masks the ragged last block; junk lanes are
    # column-local and their stores are masked off.
    x_t = x.astype(jnp.float32).T                            # (IN, B)

    out_t = pl.pallas_call(
        _mlp_kernel,
        out_shape=jax.ShapeDtypeStruct((OUTPUT_SIZE, B), jnp.float32),
        grid=(pl.cdiv(B, tb),),
        in_specs=[
            # x tile marches along the batch (lane) axis -> auto double-buffered.
            pl.BlockSpec((INPUT_SIZE, tb), lambda i: (0, i)),
            # Params: constant index_map -> stay resident in VMEM across the grid.
            pl.BlockSpec((HIDDEN_SIZE, INPUT_SIZE), lambda i: (0, 0)),
            pl.BlockSpec((HIDDEN_SIZE, 1), lambda i: (0, 0)),
            pl.BlockSpec((OUTPUT_SIZE, HIDDEN_SIZE), lambda i: (0, 0)),
            pl.BlockSpec((OUTPUT_SIZE, 1), lambda i: (0, 0)),
        ],
        out_specs=pl.BlockSpec((OUTPUT_SIZE, tb), lambda i: (0, i)),
        compiler_params=pltpu.CompilerParams(
            dimension_semantics=("parallel",),   # shard batch tiles over v7x's 2 TCs
            vmem_limit_bytes=32 * 1024 * 1024,   # headroom for the 64K-lane tile cap
        ),
    )(x_t, w1, b1c, w2, b2c)

    return out_t.T                                           # (B, OUT)


if __name__ == "__main__":
    key = jax.random.PRNGKey(0)
    k_x, k_w1, k_b1, k_w2, k_b2 = jax.random.split(key, 5)

    # Deterministic parameter init (PyTorch nn.Linear layout: weight (out, in))
    w1 = jax.random.uniform(k_w1, (HIDDEN_SIZE, INPUT_SIZE),
                            minval=-0.5, maxval=0.5, dtype=jnp.float32)
    b1 = jax.random.uniform(k_b1, (HIDDEN_SIZE,),
                            minval=-0.5, maxval=0.5, dtype=jnp.float32)
    w2 = jax.random.uniform(k_w2, (OUTPUT_SIZE, HIDDEN_SIZE),
                            minval=-0.25, maxval=0.25, dtype=jnp.float32)
    b2 = jax.random.uniform(k_b2, (OUTPUT_SIZE,),
                            minval=-0.25, maxval=0.25, dtype=jnp.float32)

    params = prepare_params(w1, b1, w2, b2)   # one-time packing (hoisted prep)

    def ref_fwd(x):
        h = jax.nn.sigmoid(x @ w1.T + b1)
        return jax.nn.softmax(h @ w2.T + b2, axis=1)

    # Small batch (single ragged block) and a multi-tile batch (grid of 2 with a
    # ragged second block) to exercise the grid / masked-edge paths.
    for name, B in (("small", 8), ("multi_tile", 300)):
        kx = jax.random.fold_in(k_x, B)
        x = jax.random.normal(kx, (B, INPUT_SIZE), dtype=jnp.float32)

        probs = jax.block_until_ready(mlp_forward(x, params))
        ref = ref_fwd(x)

        assert probs.shape == (B, OUTPUT_SIZE), f"{name}: bad shape {probs.shape}"
        # Exact (non-approximate) math inside the kernel -> tight tolerances.
        assert jnp.allclose(probs, ref, atol=1e-5), f"{name}: mismatch vs reference"
        assert jnp.allclose(jnp.sum(probs, axis=1), 1.0, atol=1e-5), \
            f"{name}: rows not normalized"

    print("KERNEL_OK")
</pallas_src>

<mosaic_0001>
module attributes {stable_mosaic.version = 11 : i64} {
  func.func @_mlp_kernel(%arg0: i32, %arg1: memref<4x8xf32, #tpu.memory_space<vmem>>, %arg2: memref<16x4xf32, #tpu.memory_space<vmem>>, %arg3: memref<16x1xf32, #tpu.memory_space<vmem>>, %arg4: memref<3x16xf32, #tpu.memory_space<vmem>>, %arg5: memref<3x1xf32, #tpu.memory_space<vmem>>, %arg6: memref<3x8xf32, #tpu.memory_space<vmem>>) attributes {dimension_semantics = [#tpu.dimension_semantics<parallel>], iteration_bounds = array<i64: 1>, scalar_prefetch = 0 : i64, scratch_operands = 0 : i64, tpu.core_type = #tpu.core_type<tc>, window_params = [{transform_indices = @transform_0, window_bounds = array<i64: 4, 8>}, {pipeline_mode = #tpu.pipeline_mode<synchronous>, transform_indices = @transform_1, window_bounds = array<i64: 16, 4>}, {pipeline_mode = #tpu.pipeline_mode<synchronous>, transform_indices = @transform_2, window_bounds = array<i64: 16, 1>}, {pipeline_mode = #tpu.pipeline_mode<synchronous>, transform_indices = @transform_3, window_bounds = array<i64: 3, 16>}, {pipeline_mode = #tpu.pipeline_mode<synchronous>, transform_indices = @transform_4, window_bounds = array<i64: 3, 1>}, {transform_indices = @transform_5, window_bounds = array<i64: 3, 8>}]} {
    %c0 = arith.constant 0 : index
    %c0_0 = arith.constant 0 : index
    %0 = vector.load %arg1[%c0, %c0_0] : memref<4x8xf32, #tpu.memory_space<vmem>>, vector<4x8xf32>
    %c0_1 = arith.constant 0 : index
    %c0_2 = arith.constant 0 : index
    %1 = vector.load %arg2[%c0_1, %c0_2] : memref<16x4xf32, #tpu.memory_space<vmem>>, vector<16x4xf32>
    %c0_3 = arith.constant 0 : index
    %c0_4 = arith.constant 0 : index
    %2 = vector.load %arg4[%c0_3, %c0_4] : memref<3x16xf32, #tpu.memory_space<vmem>>, vector<3x16xf32>
    %c0_5 = arith.constant 0 : index
    %c0_6 = arith.constant 0 : index
    %3 = vector.load %arg3[%c0_5, %c0_6] : memref<16x1xf32, #tpu.memory_space<vmem>>, vector<16x1xf32>
    %4 = vector.extract_strided_slice %1 {offsets = [0, 0], sizes = [16, 1], strides = [1, 1]} : vector<16x4xf32> to vector<16x1xf32>
    %5 = vector.extract_strided_slice %0 {offsets = [0, 0], sizes = [1, 8], strides = [1, 1]} : vector<4x8xf32> to vector<1x8xf32>
    %6 = vector.broadcast %4 : vector<16x1xf32> to vector<16x8xf32>
    %7 = vector.broadcast %5 : vector<1x8xf32> to vector<16x8xf32>
    %8 = arith.mulf %6, %7 : vector<16x8xf32>
    %9 = vector.broadcast %3 : vector<16x1xf32> to vector<16x8xf32>
    %10 = arith.addf %9, %8 : vector<16x8xf32>
    %11 = vector.extract_strided_slice %1 {offsets = [0, 1], sizes = [16, 1], strides = [1, 1]} : vector<16x4xf32> to vector<16x1xf32>
    %12 = vector.extract_strided_slice %0 {offsets = [1, 0], sizes = [1, 8], strides = [1, 1]} : vector<4x8xf32> to vector<1x8xf32>
    %13 = vector.broadcast %11 : vector<16x1xf32> to vector<16x8xf32>
    %14 = vector.broadcast %12 : vector<1x8xf32> to vector<16x8xf32>
    %15 = arith.mulf %13, %14 : vector<16x8xf32>
    %16 = arith.addf %10, %15 : vector<16x8xf32>
    %17 = vector.extract_strided_slice %1 {offsets = [0, 2], sizes = [16, 1], strides = [1, 1]} : vector<16x4xf32> to vector<16x1xf32>
    %18 = vector.extract_strided_slice %0 {offsets = [2, 0], sizes = [1, 8], strides = [1, 1]} : vector<4x8xf32> to vector<1x8xf32>
    %19 = vector.broadcast %17 : vector<16x1xf32> to vector<16x8xf32>
    %20 = vector.broadcast %18 : vector<1x8xf32> to vector<16x8xf32>
    %21 = arith.mulf %19, %20 : vector<16x8xf32>
    %22 = arith.addf %16, %21 : vector<16x8xf32>
    %23 = vector.extract_strided_slice %1 {offsets = [0, 3], sizes = [16, 1], strides = [1, 1]} : vector<16x4xf32> to vector<16x1xf32>
    %24 = vector.extract_strided_slice %0 {offsets = [3, 0], sizes = [1, 8], strides = [1, 1]} : vector<4x8xf32> to vector<1x8xf32>
    %25 = vector.broadcast %23 : vector<16x1xf32> to vector<16x8xf32>
    %26 = vector.broadcast %24 : vector<1x8xf32> to vector<16x8xf32>
    %27 = arith.mulf %25, %26 : vector<16x8xf32>
    %28 = arith.addf %22, %27 : vector<16x8xf32>
    %cst = arith.constant 0.000000e+00 : f32
    %29 = vector.broadcast %cst : f32 to vector<16x8xf32>
    %30 = arith.subf %29, %28 : vector<16x8xf32>
    %31 = math.exp %30 : vector<16x8xf32>
    %cst_7 = arith.constant 1.000000e+00 : f32
    %32 = vector.broadcast %cst_7 : f32 to vector<16x8xf32>
    %33 = arith.addf %32, %31 : vector<16x8xf32>
    %cst_8 = arith.constant 1.000000e+00 : f32
    %34 = vector.broadcast %cst_8 : f32 to vector<16x8xf32>
    %35 = arith.divf %34, %33 : vector<16x8xf32>
    %c0_9 = arith.constant 0 : index
    %c0_10 = arith.constant 0 : index
    %36 = vector.load %arg5[%c0_9, %c0_10] : memref<3x1xf32, #tpu.memory_space<vmem>>, vector<3x1xf32>
    %37 = vector.extract_strided_slice %2 {offsets = [0, 0], sizes = [3, 1], strides = [1, 1]} : vector<3x16xf32> to vector<3x1xf32>
    %38 = vector.extract_strided_slice %35 {offsets = [0, 0], sizes = [1, 8], strides = [1, 1]} : vector<16x8xf32> to vector<1x8xf32>
    %39 = vector.broadcast %37 : vector<3x1xf32> to vector<3x8xf32>
    %40 = vector.broadcast %38 : vector<1x8xf32> to vector<3x8xf32>
    %41 = arith.mulf %39, %40 : vector<3x8xf32>
    %42 = vector.broadcast %36 : vector<3x1xf32> to vector<3x8xf32>
    %43 = arith.addf %42, %41 : vector<3x8xf32>
    %44 = vector.extract_strided_slice %2 {offsets = [0, 1], sizes = [3, 1], strides = [1, 1]} : vector<3x16xf32> to vector<3x1xf32>
    %45 = vector.extract_strided_slice %35 {offsets = [1, 0], sizes = [1, 8], strides = [1, 1]} : vector<16x8xf32> to vector<1x8xf32>
    %46 = vector.broadcast %44 : vector<3x1xf32> to vector<3x8xf32>
    %47 = vector.broadcast %45 : vector<1x8xf32> to vector<3x8xf32>
    %48 = arith.mulf %46, %47 : vector<3x8xf32>
    %49 = arith.addf %43, %48 : vector<3x8xf32>
    %50 = vector.extract_strided_slice %2 {offsets = [0, 2], sizes = [3, 1], strides = [1, 1]} : vector<3x16xf32> to vector<3x1xf32>
    %51 = vector.extract_strided_slice %35 {offsets = [2, 0], sizes = [1, 8], strides = [1, 1]} : vector<16x8xf32> to vector<1x8xf32>
    %52 = vector.broadcast %50 : vector<3x1xf32> to vector<3x8xf32>
    %53 = vector.broadcast %51 : vector<1x8xf32> to vector<3x8xf32>
    %54 = arith.mulf %52, %53 : vector<3x8xf32>
    %55 = arith.addf %49, %54 : vector<3x8xf32>
    %56 = vector.extract_strided_slice %2 {offsets = [0, 3], sizes = [3, 1], strides = [1, 1]} : vector<3x16xf32> to vector<3x1xf32>
    %57 = vector.extract_strided_slice %35 {offsets = [3, 0], sizes = [1, 8], strides = [1, 1]} : vector<16x8xf32> to vector<1x8xf32>
    %58 = vector.broadcast %56 : vector<3x1xf32> to vector<3x8xf32>
    %59 = vector.broadcast %57 : vector<1x8xf32> to vector<3x8xf32>
    %60 = arith.mulf %58, %59 : vector<3x8xf32>
    %61 = arith.addf %55, %60 : vector<3x8xf32>
    %62 = vector.extract_strided_slice %2 {offsets = [0, 4], sizes = [3, 1], strides = [1, 1]} : vector<3x16xf32> to vector<3x1xf32>
    %63 = vector.extract_strided_slice %35 {offsets = [4, 0], sizes = [1, 8], strides = [1, 1]} : vector<16x8xf32> to vector<1x8xf32>
    %64 = vector.broadcast %62 : vector<3x1xf32> to vector<3x8xf32>
    %65 = vector.broadcast %63 : vector<1x8xf32> to vector<3x8xf32>
    %66 = arith.mulf %64, %65 : vector<3x8xf32>
    %67 = arith.addf %61, %66 : vector<3x8xf32>
    %68 = vector.extract_strided_slice %2 {offsets = [0, 5], sizes = [3, 1], strides = [1, 1]} : vector<3x16xf32> to vector<3x1xf32>
    %69 = vector.extract_strided_slice %35 {offsets = [5, 0], sizes = [1, 8], strides = [1, 1]} : vector<16x8xf32> to vector<1x8xf32>
    %70 = vector.broadcast %68 : vector<3x1xf32> to vector<3x8xf32>
    %71 = vector.broadcast %69 : vector<1x8xf32> to vector<3x8xf32>
    %72 = arith.mulf %70, %71 : vector<3x8xf32>
    %73 = arith.addf %67, %72 : vector<3x8xf32>
    %74 = vector.extract_strided_slice %2 {offsets = [0, 6], sizes = [3, 1], strides = [1, 1]} : vector<3x16xf32> to vector<3x1xf32>
    %75 = vector.extract_strided_slice %35 {offsets = [6, 0], sizes = [1, 8], strides = [1, 1]} : vector<16x8xf32> to vector<1x8xf32>
    %76 = vector.broadcast %74 : vector<3x1xf32> to vector<3x8xf32>
    %77 = vector.broadcast %75 : vector<1x8xf32> to vector<3x8xf32>
    %78 = arith.mulf %76, %77 : vector<3x8xf32>
    %79 = arith.addf %73, %78 : vector<3x8xf32>
    %80 = vector.extract_strided_slice %2 {offsets = [0, 7], sizes = [3, 1], strides = [1, 1]} : vector<3x16xf32> to vector<3x1xf32>
    %81 = vector.extract_strided_slice %35 {offsets = [7, 0], sizes = [1, 8], strides = [1, 1]} : vector<16x8xf32> to vector<1x8xf32>
    %82 = vector.broadcast %80 : vector<3x1xf32> to vector<3x8xf32>
    %83 = vector.broadcast %81 : vector<1x8xf32> to vector<3x8xf32>
    %84 = arith.mulf %82, %83 : vector<3x8xf32>
    %85 = arith.addf %79, %84 : vector<3x8xf32>
    %86 = vector.extract_strided_slice %2 {offsets = [0, 8], sizes = [3, 1], strides = [1, 1]} : vector<3x16xf32> to vector<3x1xf32>
    %87 = vector.extract_strided_slice %35 {offsets = [8, 0], sizes = [1, 8], strides = [1, 1]} : vector<16x8xf32> to vector<1x8xf32>
    %88 = vector.broadcast %86 : vector<3x1xf32> to vector<3x8xf32>
    %89 = vector.broadcast %87 : vector<1x8xf32> to vector<3x8xf32>
    %90 = arith.mulf %88, %89 : vector<3x8xf32>
    %91 = arith.addf %85, %90 : vector<3x8xf32>
    %92 = vector.extract_strided_slice %2 {offsets = [0, 9], sizes = [3, 1], strides = [1, 1]} : vector<3x16xf32> to vector<3x1xf32>
    %93 = vector.extract_strided_slice %35 {offsets = [9, 0], sizes = [1, 8], strides = [1, 1]} : vector<16x8xf32> to vector<1x8xf32>
    %94 = vector.broadcast %92 : vector<3x1xf32> to vector<3x8xf32>
    %95 = vector.broadcast %93 : vector<1x8xf32> to vector<3x8xf32>
    %96 = arith.mulf %94, %95 : vector<3x8xf32>
    %97 = arith.addf %91, %96 : vector<3x8xf32>
    %98 = vector.extract_strided_slice %2 {offsets = [0, 10], sizes = [3, 1], strides = [1, 1]} : vector<3x16xf32> to vector<3x1xf32>
    %99 = vector.extract_strided_slice %35 {offsets = [10, 0], sizes = [1, 8], strides = [1, 1]} : vector<16x8xf32> to vector<1x8xf32>
    %100 = vector.broadcast %98 : vector<3x1xf32> to vector<3x8xf32>
    %101 = vector.broadcast %99 : vector<1x8xf32> to vector<3x8xf32>
    %102 = arith.mulf %100, %101 : vector<3x8xf32>
    %103 = arith.addf %97, %102 : vector<3x8xf32>
    %104 = vector.extract_strided_slice %2 {offsets = [0, 11], sizes = [3, 1], strides = [1, 1]} : vector<3x16xf32> to vector<3x1xf32>
    %105 = vector.extract_strided_slice %35 {offsets = [11, 0], sizes = [1, 8], strides = [1, 1]} : vector<16x8xf32> to vector<1x8xf32>
    %106 = vector.broadcast %104 : vector<3x1xf32> to vector<3x8xf32>
    %107 = vector.broadcast %105 : vector<1x8xf32> to vector<3x8xf32>
    %108 = arith.mulf %106, %107 : vector<3x8xf32>
    %109 = arith.addf %103, %108 : vector<3x8xf32>
    %110 = vector.extract_strided_slice %2 {offsets = [0, 12], sizes = [3, 1], strides = [1, 1]} : vector<3x16xf32> to vector<3x1xf32>
    %111 = vector.extract_strided_slice %35 {offsets = [12, 0], sizes = [1, 8], strides = [1, 1]} : vector<16x8xf32> to vector<1x8xf32>
    %112 = vector.broadcast %110 : vector<3x1xf32> to vector<3x8xf32>
    %113 = vector.broadcast %111 : vector<1x8xf32> to vector<3x8xf32>
    %114 = arith.mulf %112, %113 : vector<3x8xf32>
    %115 = arith.addf %109, %114 : vector<3x8xf32>
    %116 = vector.extract_strided_slice %2 {offsets = [0, 13], sizes = [3, 1], strides = [1, 1]} : vector<3x16xf32> to vector<3x1xf32>
    %117 = vector.extract_strided_slice %35 {offsets = [13, 0], sizes = [1, 8], strides = [1, 1]} : vector<16x8xf32> to vector<1x8xf32>
    %118 = vector.broadcast %116 : vector<3x1xf32> to vector<3x8xf32>
    %119 = vector.broadcast %117 : vector<1x8xf32> to vector<3x8xf32>
    %120 = arith.mulf %118, %119 : vector<3x8xf32>
    %121 = arith.addf %115, %120 : vector<3x8xf32>
    %122 = vector.extract_strided_slice %2 {offsets = [0, 14], sizes = [3, 1], strides = [1, 1]} : vector<3x16xf32> to vector<3x1xf32>
    %123 = vector.extract_strided_slice %35 {offsets = [14, 0], sizes = [1, 8], strides = [1, 1]} : vector<16x8xf32> to vector<1x8xf32>
    %124 = vector.broadcast %122 : vector<3x1xf32> to vector<3x8xf32>
    %125 = vector.broadcast %123 : vector<1x8xf32> to vector<3x8xf32>
    %126 = arith.mulf %124, %125 : vector<3x8xf32>
    %127 = arith.addf %121, %126 : vector<3x8xf32>
    %128 = vector.extract_strided_slice %2 {offsets = [0, 15], sizes = [3, 1], strides = [1, 1]} : vector<3x16xf32> to vector<3x1xf32>
    %129 = vector.extract_strided_slice %35 {offsets = [15, 0], sizes = [1, 8], strides = [1, 1]} : vector<16x8xf32> to vector<1x8xf32>
    %130 = vector.broadcast %128 : vector<3x1xf32> to vector<3x8xf32>
    %131 = vector.broadcast %129 : vector<1x8xf32> to vector<3x8xf32>
    %132 = arith.mulf %130, %131 : vector<3x8xf32>
    %133 = arith.addf %127, %132 : vector<3x8xf32>
    %cst_11 = arith.constant dense<0xFF800000> : vector<8xf32>
    %134 = vector.multi_reduction <maximumf>, %133, %cst_11 [0] : vector<3x8xf32> to vector<8xf32>
    %135 = vector.shape_cast %134 : vector<8xf32> to vector<1x8xf32>
    %136 = vector.broadcast %135 : vector<1x8xf32> to vector<3x8xf32>
    %137 = arith.subf %133, %136 : vector<3x8xf32>
    %138 = math.exp %137 : vector<3x8xf32>
    %cst_12 = arith.constant dense<0.000000e+00> : vector<8xf32>
    %139 = vector.multi_reduction <add>, %138, %cst_12 [0] : vector<3x8xf32> to vector<8xf32>
    %140 = vector.shape_cast %139 : vector<8xf32> to vector<1x8xf32>
    %141 = vector.broadcast %140 : vector<1x8xf32> to vector<3x8xf32>
    %142 = arith.divf %138, %141 : vector<3x8xf32>
    %c0_13 = arith.constant 0 : index
    %c0_14 = arith.constant 0 : index
    %143 = vector.load %arg6[%c0_13, %c0_14] : memref<3x8xf32, #tpu.memory_space<vmem>>, vector<3x8xf32>
    tpu.vector_store %arg6[%c0_13, %c0_14], %142 {strides = array<i32>} : memref<3x8xf32, #tpu.memory_space<vmem>>, vector<3x8xf32>,
    return
  }
  func.func @transform_0(%arg0: i32) -> (i32, i32) {
    %c0_i32 = arith.constant 0 : i32
    %c0_i32_0 = arith.constant 0 : i32
    return %c0_i32, %arg0 : i32, i32
  }
  func.func @transform_1(%arg0: i32) -> (i32, i32) {
    %c0_i32 = arith.constant 0 : i32
    %c0_i32_0 = arith.constant 0 : i32
    %c0_i32_1 = arith.constant 0 : i32
    return %c0_i32, %c0_i32_0 : i32, i32
  }
  func.func @transform_2(%arg0: i32) -> (i32, i32) {
    %c0_i32 = arith.constant 0 : i32
    %c0_i32_0 = arith.constant 0 : i32
    %c0_i32_1 = arith.constant 0 : i32
    return %c0_i32, %c0_i32_0 : i32, i32
  }
  func.func @transform_3(%arg0: i32) -> (i32, i32) {
    %c0_i32 = arith.constant 0 : i32
    %c0_i32_0 = arith.constant 0 : i32
    %c0_i32_1 = arith.constant 0 : i32
    return %c0_i32, %c0_i32_0 : i32, i32
  }
  func.func @transform_4(%arg0: i32) -> (i32, i32) {
    %c0_i32 = arith.constant 0 : i32
    %c0_i32_0 = arith.constant 0 : i32
    %c0_i32_1 = arith.constant 0 : i32
    return %c0_i32, %c0_i32_0 : i32, i32
  }
  func.func @transform_5(%arg0: i32) -> (i32, i32) {
    %c0_i32 = arith.constant 0 : i32
    %c0_i32_0 = arith.constant 0 : i32
    return %c0_i32, %arg0 : i32, i32
  }
}

</mosaic_0001>

<bundles_post_ra>
// kernel: mlp_forward.1
= control target key start
LH: loop header
LB: loop body
LE: loop exit
PB: predicated region body
PF: predicated region fallthrough
CT: control target
= control target key end

     0   :  { %v396_v1 = vmov 1   ;;  %v397_v2 = vmov 0   ;;  %s509_s0 = inlined_call_operand.vmem [shape: f32[4,8], index: 0, kind: input, shape index: {}]   ;;  %s510_s1 = inlined_call_operand.vmem [shape: f32[16,4], index: 1, kind: input, shape index: {}]   ;;  %s511_s2 = inlined_call_operand.vmem [shape: f32[16,1], index: 2, kind: input, shape index: {}]   ;;  %s512_s3 = inlined_call_operand.vmem [shape: f32[3,16], index: 3, kind: input, shape index: {}]   ;;  %s513_s4 = inlined_call_operand.vmem [shape: f32[3,1], index: 4, kind: input, shape index: {}]   ;;  %s514_s5 = inlined_call_operand.hbm [shape: f32[3,8], index: 5, kind: output, shape index: {}]  }
   0x1   :  { %v22_v0 = vld [vmem:[%s510_s1] sm:$0xff]  ;;  %335 = vset.pattern.permute.xlu1 %v396_v1  ;;  %334 = vset.pattern.permute.xlu0 %v397_v2 }
   0x2   :  { %56 = vperm.xlu1 %335, %v22_v0   ;;  %29 = vperm.xlu0 %334, %v22_v0   ;;  %v25_v3 = vld [vmem:[%s511_s2] sm:$0xff] }
   0x3   :  { %10 = vsyncpa [#allocation3], 0  ;;  %v398_v4 = vmov 2   ;;  %v23_v5 = vld [vmem:[%s510_s1 + $0x8] sm:$0xff]  ;;  %v399_v6 = vmov 3   ;;  %v400_v10 = vmov 5   ;;  %v37_v22 = vlaneseq }
   0x4   :  { %v26_v7 = vld [vmem:[%s511_s2 + $0x8] sm:$0xff]  ;;  %v24_v8 = vld [vmem:[%s512_s3] sm:$0x7]  ;;  %v401_v11 = vmov 8   ;;  %v402_v12 = vmov 11   ;;  %v403_v13 = vmov 4  }
   0x5   :  { %v115_v9 = vld [vmem:[%s513_s4] sm:$0x7]  ;;  %v404_v14 = vmov 14   ;;  %v405_v15 = vmov 6   ;;  %v406_v16 = vmov 15   ;;  %v407_v17 = vmov 7  }
   0x6   :  { %336 = vset.pattern.permute.xlu1 %v398_v4  ;;  %45 = vperm.xlu0 %334, %v25_v3   ;;  %v408_v18 = vmov 9   ;;  %v409_v19 = vmov 10   ;;  %v410_v20 = vmov 12   ;;  %v411_v21 = vmov 13   ;;  %v21_v25 = vld [vmem:[%s509_s0] sm:$0xf] }
   0x7   :  { %72 = vperm.xlu1 %336, %v22_v0   ;;  %v461_v23 = vshrl.u32 %v37_v22, 7  ;;  %vm282_vm0 = vcmask 59392   ;;  %s412_s0 = smov [#allocation2]  }
   0x8   :  { %s309_s4 = sshll.u32 %s412_s0, 4  ;;  %s310_s4 = int_to_ptr.vmem [resolvable:$true] %s309_s4 }
   0x9   :  { %v464_v24 = vsub.s32 0, %v461_v23  ;;  %v470_v26 = vsub.s32 1, %v461_v23  ;;  %v474_v28 = vsub.s32 2, %v461_v23  ;;  %v479_v34 = vsub.s32 3, %v461_v23  ;;  %s372_s29 = scalar_lea.vmem %s310_s4, 64  ;;  %p377_p1 = scmp.lt.s32.totalorder %s310_s4, %s310_s4 }
   0xa   :  { %337 = vset.pattern.permute.xlu0 %v399_v6  ;;  %p373_p0 = scmp.ne.s32.totalorder %s310_s4, %s372_s29  ;;  %p378_p2 = scmp.lt.s32.totalorder %s372_s29, %s372_s29 }
   0xb   :  { %338 = vset.pattern.permute.xlu1 %v397_v2  ;;  %88 = vperm.xlu0 %337, %v22_v0   ;;  %v40_v27 = vrot.slane %v21_v25, %v464_v24  ;;  %v66_v31 = vrot.slane %v21_v25, %v470_v26  ;;  %v82_v33 = vrot.slane %v21_v25, %v474_v28 }
   0xc   :  { %34 = vperm.xlu1 %338, %v23_v5   ;;  %v98_v40 = vrot.slane %v21_v25, %v479_v34  ;;  %p379_p3 = por %p378_p2, %p377_p1 }
   0xe   :  { %p380_p4 = pnand %p379_p3, %p373_p0 }
   0xf   :  { %339 = vset.pattern.permute.xlu0 %v396_v1 }
  0x10   :  { %50 = vperm.xlu1 %338, %v26_v7   ;;  %60 = vperm.xlu0 %339, %v23_v5  }
  0x14   :  { %340 = vset.pattern.permute.xlu1 %v398_v4  ;;  %342 = vset.pattern.permute.xlu0 %v397_v2 }
  0x15   :  { %76 = vperm.xlu1 %340, %v23_v5   ;;  %118 = vperm.xlu0 %342, %v24_v8  }
  0x19   :  { %341 = vset.pattern.permute.xlu1 %v399_v6  ;;  %345 = vset.pattern.permute.xlu0 %v398_v4 }
  0x1a   :  { %92 = vperm.xlu1 %341, %v23_v5   ;;  %143 = vperm.xlu0 %345, %v24_v8  }
  0x1e   :  { %343 = vset.pattern.permute.xlu1 %v397_v2  ;;  %348 = vset.pattern.permute.xlu0 %v400_v10 }
  0x1f   :  { %128 = vperm.xlu1 %343, %v115_v9   ;;  %173 = vperm.xlu0 %348, %v24_v8  }
  0x23   :  { %344 = vset.pattern.permute.xlu1 %v396_v1  ;;  %351 = vset.pattern.permute.xlu0 %v401_v11 }
  0x24   :  { %133 = vperm.xlu1 %344, %v24_v8   ;;  %203 = vperm.xlu0 %351, %v24_v8  }
  0x28   :  { %346 = vset.pattern.permute.xlu1 %v399_v6  ;;  %354 = vset.pattern.permute.xlu0 %v402_v12  ;;  %v168_v12 = vsub.s32 4, %v461_v23 }
  0x29   :  { %153 = vperm.xlu1 %346, %v24_v8   ;;  %233 = vperm.xlu0 %354, %v24_v8  }
  0x2d   :  { %347 = vset.pattern.permute.xlu1 %v403_v13  ;;  %357 = vset.pattern.permute.xlu0 %v404_v14 }
  0x2e   :  { %163 = vperm.xlu1 %347, %v24_v8   ;;  %263 = vperm.xlu0 %357, %v24_v8  }
  0x32   :  { %349 = vset.pattern.permute.xlu1 %v405_v15  ;;  %359 = vset.pattern.permute.xlu0 %v406_v16  ;;  %v178_v15 = vsub.s32 5, %v461_v23 }
  0x33   :  { %183 = vperm.xlu1 %349, %v24_v8  }
  0x37   :  { %350 = vset.pattern.permute.xlu1 %v407_v17 }
  0x38   :  { %193 = vperm.xlu1 %350, %v24_v8  }
  0x3c   :  { %352 = vset.pattern.permute.xlu1 %v408_v18 }
  0x3d   :  { %213 = vperm.xlu1 %352, %v24_v8  }
  0x41   :  { %353 = vset.pattern.permute.xlu1 %v409_v19 }
  0x42   :  { %223 = vperm.xlu1 %353, %v24_v8  }
  0x46   :  { %355 = vset.pattern.permute.xlu1 %v410_v20 }
  0x47   :  { %243 = vperm.xlu1 %355, %v24_v8  }
  0x4b   :  { %356 = vset.pattern.permute.xlu1 %v411_v21 }
  0x4c   :  { %253 = vperm.xlu1 %356, %v24_v8  }
  0x50   :  { %358 = vset.pattern.permute.xlu1 %v406_v16 }
  0x51   :  { %273 = vperm.xlu1 %358, %v24_v8  }
  0x81   :  { %v57_v29 = vpop.permute.xlu1 %56  ;;  %v30_v30 = vpop.permute.xlu0 %29 }
  0x82   :  { %v41_v32 = vmul.f32 %v40_v27, %v30_v30  ;;  %v67_v36 = vmul.f32 %v66_v31, %v57_v29  ;;  %v188_v30 = vsub.s32 6, %v461_v23 }
  0x85   :  { %v46_v35 = vpop.permute.xlu0 %45 }
  0x86   :  { %v53_v37 = vadd.f32 %v46_v35, %v41_v32  ;;  %v73_v38 = vpop.permute.xlu1 %72  ;;  %v198_v35 = vsub.s32 7, %v461_v23 }
  0x87   :  { %v83_v39 = vmul.f32 %v82_v33, %v73_v38 }
  0x88   :  { %v69_v41 = vadd.f32 %v67_v36, %v53_v37 }
  0x8a   :  { %v85_v42 = vadd.f32 %v83_v39, %v69_v41  ;;  %v89_v43 = vpop.permute.xlu0 %88 }
  0x8b   :  { %v99_v44 = vmul.f32 %v98_v40, %v89_v43  ;;  %v35_v45 = vpop.permute.xlu1 %34 }
  0x8c   :  { %v42_v51 = vmul.f32 %v40_v27, %v35_v45 }
  0x8d   :  { %v101_v46 = vadd.f32 %v99_v44, %v85_v42 }
  0x8f   :  { %v103_v47 = vsub.f32 0.0, %v101_v46  ;;  %v51_v48 = vpop.permute.xlu1 %50  ;;  %v61_v50 = vpop.permute.xlu0 %60 }
  0x90   :  { %v54_v52 = vadd.f32 %v51_v48, %v42_v51  ;;  %v68_v53 = vmul.f32 %v66_v31, %v61_v50 }
  0x91   :  { %v105_v49 = vmul.f32 1.442695, %v103_v47 }
  0x92   :  { %v70_v56 = vadd.f32 %v68_v53, %v54_v52 }
  0x93   :  { %360 = vpow2.f32 %v105_v49 }
  0x94   :  { %v77_v54 = vpop.permute.xlu1 %76  ;;  %v119_v3 = vpop.permute.xlu0 %118 }
  0x95   :  { %v84_v55 = vmul.f32 %v82_v33, %v77_v54 }
  0x97   :  { %v86_v58 = vadd.f32 %v84_v55, %v70_v56 }
  0x99   :  { %v93_v57 = vpop.permute.xlu1 %92  ;;  %v144_v14 = vpop.permute.xlu0 %143 }
  0x9a   :  { %v100_v59 = vmul.f32 %v98_v40, %v93_v57 }
  0x9c   :  { %v102_v60 = vadd.f32 %v100_v59, %v86_v58 }
  0x9d   :  { %v361_v61 = vpop.eup %360 }
  0x9e   :  { %v109_v62 = vadd.f32 1.0, %v361_v61  ;;  %v104_v63 = vsub.f32 0.0, %v102_v60  ;;  %v129_v0 = vpop.permute.xlu1 %128  ;;  %v174_v31 = vpop.permute.xlu0 %173 }
  0xa0   :  { %362 = vrcp.f32 %v109_v62  ;;  %v107_v1 = vmul.f32 1.442695, %v104_v63 }
  0xa2   :  { %364 = vpow2.f32 %v107_v1 }
  0xa3   :  { %v134_v2 = vpop.permute.xlu1 %133  ;;  %v204_v46 = vpop.permute.xlu0 %203 }
  0xa8   :  { %v154_v4 = vpop.permute.xlu1 %153  ;;  %v234_v59 = vpop.permute.xlu0 %233 }
  0xaa   :  { %v363_v5 = vpop.eup %362 }
  0xab   :  { %v139_v6 = vrot.slane %v363_v5, %v470_v26  ;;  %v124_v7 = vrot.slane %v363_v5, %v464_v24  ;;  %v149_v11 = vrot.slane %v363_v5, %v474_v28  ;;  %v159_v18 = vrot.slane %v363_v5, %v479_v34 }
  0xac   :  { %v365_v8 = vpop.eup %364  ;;  %v169_v21 = vrot.slane %v363_v5, %v168_v12  ;;  %v179_v29 = vrot.slane %v363_v5, %v178_v15  ;;  %v189_v38 = vrot.slane %v363_v5, %v188_v30  ;;  %v199_v43 = vrot.slane %v363_v5, %v198_v35 }
  0xad   :  { %v110_v9 = vadd.f32 1.0, %v365_v8  ;;  %v125_v10 = vmul.f32 %v124_v7, %v119_v3  ;;  %v164_v13 = vpop.permute.xlu1 %163  ;;  %v140_v16 = vmul.f32 %v139_v6, %v134_v2  ;;  %v150_v20 = vmul.f32 %v149_v11, %v144_v14  ;;  %v264_v1 = vpop.permute.xlu0 %263 }
  0xae   :  { %v160_v25 = vmul.f32 %v159_v18, %v154_v4  ;;  %v170_v33 = vmul.f32 %v169_v21, %v164_v13  ;;  %v180_v36 = vmul.f32 %v179_v29, %v174_v31 }
  0xaf   :  { %366 = vrcp.f32 %v110_v9  ;;  %v131_v17 = vadd.f32 %v129_v0, %v125_v10 }
  0xb1   :  { %v141_v19 = vadd.f32 %v140_v16, %v131_v17 }
  0xb2   :  { %v184_v22 = vpop.permute.xlu1 %183 }
  0xb3   :  { %v151_v27 = vadd.f32 %v150_v20, %v141_v19  ;;  %v190_v42 = vmul.f32 %v189_v38, %v184_v22 }
  0xb5   :  { %v161_v32 = vadd.f32 %v160_v25, %v151_v27 }
  0xb7   :  { %v171_v37 = vadd.f32 %v170_v33, %v161_v32  ;;  %v194_v39 = vpop.permute.xlu1 %193 }
  0xb8   :  { %v200_v47 = vmul.f32 %v199_v43, %v194_v39 }
  0xb9   :  { %v367_v40 = vpop.eup %366  ;;  %v181_v41 = vadd.f32 %v180_v36, %v171_v37 }
  0xba   :  { %v209_v44 = vrot.slane %v367_v40, %v464_v24  ;;  %v219_v48 = vrot.slane %v367_v40, %v470_v26  ;;  %v229_v53 = vrot.slane %v367_v40, %v474_v28  ;;  %v239_v56 = vrot.slane %v367_v40, %v479_v34 }
  0xbb   :  { %v191_v45 = vadd.f32 %v190_v42, %v181_v41  ;;  %v249_v61 = vrot.slane %v367_v40, %v168_v12  ;;  %v269_v26 = vrot.slane %v367_v40, %v188_v30  ;;  %v259_v0 = vrot.slane %v367_v40, %v178_v15 }
  0xbc   :  { %v210_v49 = vmul.f32 %v209_v44, %v204_v46  ;;  %v214_v50 = vpop.permute.xlu1 %213  ;;  %v240_v24 = vmul.f32 %v239_v56, %v234_v59  ;;  %v279_v6 = vrot.slane %v367_v40, %v198_v35 }
  0xbd   :  { %v201_v51 = vadd.f32 %v200_v47, %v191_v45  ;;  %v220_v23 = vmul.f32 %v219_v48, %v214_v50  ;;  %v270_v5 = vmul.f32 %v269_v26, %v264_v1 }
  0xbf   :  { %v211_v52 = vadd.f32 %v210_v49, %v201_v51 }
  0xc1   :  { %v221_v54 = vadd.f32 %v220_v23, %v211_v52  ;;  %v224_v55 = vpop.permute.xlu1 %223 }
  0xc2   :  { %v230_v57 = vmul.f32 %v229_v53, %v224_v55 }
  0xc4   :  { %v231_v58 = vadd.f32 %v230_v57, %v221_v54 }
  0xc6   :  { %v244_v60 = vpop.permute.xlu1 %243  ;;  %v241_v62 = vadd.f32 %v240_v24, %v231_v58 }
  0xc7   :  { %v250_v63 = vmul.f32 %v249_v61, %v244_v60 }
  0xc9   :  { %v251_v3 = vadd.f32 %v250_v63, %v241_v62 }
  0xcb   :  { %v254_v2 = vpop.permute.xlu1 %253 }
  0xcc   :  { %v260_v4 = vmul.f32 %v259_v0, %v254_v2 }
  0xce   :  { %v261_v28 = vadd.f32 %v260_v4, %v251_v3 }
  0xd0   :  { %v274_v7 = vpop.permute.xlu1 %273  ;;  %v271_v8 = vadd.f32 %v270_v5, %v261_v28 }
  0xd1   :  { %v280_v34 = vmul.f32 %v279_v6, %v274_v7 }
  0xd3   :  { %v281_v9 = vadd.f32 %v280_v34, %v271_v8 }
  0xd5   :  { %v283_v10 = vsel %vm282_vm0, %v281_v9, -inf }
  0xd6   :  { %v284_v11 = vrot.slane %v283_v10, 4 }
  0xd8   :  { %v285_v12 = vmax.f32 %v283_v10, %v284_v11 }
  0xda   :  { %v286_v13 = vrot.slane %v285_v12, 2 }
  0xdc   :  { %v287_v14 = vmax.f32 %v285_v12, %v286_v13 }
  0xde   :  { %v288_v16 = vrot.slane %v287_v14, 1 }
  0xe0   :  { %v289_v15 = vmax.f32 %v287_v14, %v288_v16 }
  0xe2   :  { %v290_v17 = vsub.f32 %v281_v9, %v289_v15 }
  0xe4   :  { %v291_v18 = vmul.f32 1.442695, %v290_v17 }
  0xe6   :  { %368 = vpow2.f32 %v291_v18 }
  0xf0   :  { %v369_v19 = vpop.eup %368 }
  0xf1   :  { %v293_v20 = vsel %vm282_vm0, %v369_v19, 0.0 }
  0xf2   :  { %v294_v21 = vrot.slane %v293_v20, 4 }
  0xf4   :  { %v295_v22 = vadd.f32 %v294_v21, %v293_v20 }
  0xf6   :  { %v296_v25 = vrot.slane %v295_v22, 2 }
  0xf8   :  { %v297_v27 = vadd.f32 %v296_v25, %v295_v22 }
  0xfa   :  { %v298_v29 = vrot.slane %v297_v27, 1 }
  0xfc   :  { %v299_v30 = vadd.f32 %v298_v29, %v297_v27 }
  0xfe   :  { %370 = vrcp.f32 %v299_v30 }
 0x108   :  { %v371_v31 = vpop.eup %370 }
 0x109   :  { %v301_v32 = vmul.f32 %v371_v31, %v369_v19 }
 0x10b   :  { %302 = vst.msk [vmem:[#allocation2] sm:$0x7] %vm282_vm0, %v301_v32 }
 0x10c   :  { %383 = shalt.err (!%p380_p4)
}
 0x10d   :  { %s384_s7 = scalar_lea.hbm %s514_s5, 64 }
 0x10e   :  { %p385_p5 = scmp.ne.s32.totalorder %s514_s5, %s384_s7  ;;  %p388_p6 = scmp.lt.u32.totalorder %s384_s7, %s514_s5 }
 0x110   :  { %p390_p7 = pnand %p388_p6, %p385_p5 }
 0x112   :  { %393 = shalt.err (!%p390_p7)
}
 0x113   :  { %312 = dma.vmem_to_hbm [thread:$0]  %s310_s4, 64, %s514_s5, [#allocation3]  }
 0x114   :  { %394 = dma.done.wait [#allocation3], 64  }
 0x115   :  { %395 = vsyncadd [#allocation3], 4294967232 }
 0x116   :  { %316 = vsyncpa [#allocation3], 1 }

</bundles_post_ra>
